<compile_context>
chip_gen: v7x
topology: tpu7x:2x2x1
jax: 0.10.0
libtpu: 0.0.40
codegen_flags: <defaults>
</compile_context>

<pallas_src>
import functools

import jax
import jax.numpy as jnp
from jax.experimental import pallas as pl
from jax.experimental.pallas import tpu as pltpu


def _round_up(x, m):
    return (x + m - 1) // m * m


def _cdiv(a, b):
    return -(-a // b)


# ----------------------------------------------------------------------------
# Kernel
# ----------------------------------------------------------------------------
def _mlp_kernel(x_ref,
                w1_ref, t1_ref,
                w2_ref, t2_ref,
                w3_ref, t3_ref,
                w4_ref, b4_ref,
                o_ref,
                *, act_dtype):
    """Fused 4-layer MLP forward for one batch tile (BN folded into weights)."""

    def hidden_layer(h_bf16, w_ref, t_ref):
        # MXU matmul, f32 accumulation.
        acc = jnp.dot(h_bf16, w_ref[...], preferred_element_type=jnp.float32)
        # BN shift + sigmoid: bf16 on v6e/v7x (bf16 EUP exp), f32 on v5e.
        z = acc.astype(act_dtype) + t_ref[...]
        e = jnp.exp(-z)                                    # EUP
        s = pl.reciprocal((1.0 + e).astype(jnp.float32),   # EUP vrcp (f32 path)
                          approx=True)
        return s.astype(jnp.bfloat16)                      # next matmul input

    h = hidden_layer(x_ref[...].astype(jnp.bfloat16), w1_ref, t1_ref)
    h = hidden_layer(h, w2_ref, t2_ref)
    h = hidden_layer(h, w3_ref, t3_ref)

    # Output layer at its true (narrow) width: Linear -> ReLU.
    out = jnp.dot(h, w4_ref[...], preferred_element_type=jnp.float32)
    out = out + b4_ref[...]
    o_ref[...] = jnp.maximum(out, 0.0).astype(o_ref.dtype)


# ----------------------------------------------------------------------------
# Parameter preparation (done once, outside the per-call forward)
# ----------------------------------------------------------------------------
def _fold_bn(w, b, gamma, beta, rmean, rvar, act_dtype, eps=1e-5):
    """Fold Linear bias + eval-mode BatchNorm1d into (bf16 scaled W, shift)."""
    s = gamma / jnp.sqrt(rvar + eps)
    w_scaled = (w * s[None, :]).astype(jnp.bfloat16)
    shift = (s * (b - rmean) + beta).reshape(1, -1).astype(act_dtype)
    return w_scaled, shift


def prepare_params(params, act_dtype=jnp.float32):
    """Fold BN + cast weights ONCE; reuse the result across forward calls."""
    (w1, b1, g1, be1, m1, v1,
     w2, b2, g2, be2, m2, v2,
     w3, b3, g3, be3, m3, v3,
     w4, b4) = params
    w1f, t1 = _fold_bn(w1, b1, g1, be1, m1, v1, act_dtype)
    w2f, t2 = _fold_bn(w2, b2, g2, be2, m2, v2, act_dtype)
    w3f, t3 = _fold_bn(w3, b3, g3, be3, m3, v3, act_dtype)
    w4f = w4.astype(jnp.bfloat16)
    b4f = b4.reshape(1, -1).astype(jnp.float32)
    return (w1f, t1, w2f, t2, w3f, t3, w4f, b4f)


def _select_act_dtype():
    """bf16 VPU/EUP path exists on v6e / v7x; keep f32 elsewhere (v5e etc.)."""
    try:
        kind = jax.devices()[0].device_kind.lower()
    except Exception:
        return jnp.float32
    if any(tag in kind for tag in ("v6", "v7", "7x")):
        return jnp.bfloat16
    return jnp.float32


# ----------------------------------------------------------------------------
# Tiling heuristic: exact batch coverage, even #steps for v7x megacore
# ----------------------------------------------------------------------------
def _choose_tiling(B, tm_cap=2048):
    """Return (tm, b_pad): tm multiple of 8; minimal pad; even grid when split.

    tm_cap=2048 keeps every tile comfortably inside the default scoped VMEM
    limit on all generations (incl. v7x's 64 MiB physical VMEM); raise only
    with a matching vmem_limit_bytes.
    """
    if B <= 512:
        tm = _round_up(B, 8)
        return tm, tm                      # single tile
    n_steps = max(2, _cdiv(B, tm_cap))
    if n_steps % 2:                        # even split across 2 TensorCores
        n_steps += 1
    tm = _round_up(_cdiv(B, n_steps), 8)
    return tm, tm * n_steps


# ----------------------------------------------------------------------------
# Forward
# ----------------------------------------------------------------------------
@functools.partial(jax.jit, static_argnames=("act_dtype",))
def mlp_forward(x, folded_params, act_dtype=jnp.float32):
    (w1f, t1, w2f, t2, w3f, t3, w4f, b4f) = folded_params
    B, d_in = x.shape
    out_dim = w4f.shape[1]

    tm, b_pad = _choose_tiling(B)
    if b_pad != B:
        x = jnp.pad(x, ((0, b_pad - B), (0, 0)))
    grid = (b_pad // tm,)

    def resident(a):
        # Constant block index + single buffer: fetched once, stays VMEM-resident
        # across grid steps, no wasted second buffer.
        return pl.BlockSpec(a.shape, lambda i: (0, 0),
                            pipeline_mode=pl.Buffered(1))

    kernel = functools.partial(_mlp_kernel, act_dtype=act_dtype)

    out = pl.pallas_call(
        kernel,
        out_shape=jax.ShapeDtypeStruct((b_pad, out_dim), x.dtype),
        grid=grid,
        in_specs=[
            pl.BlockSpec((tm, d_in), lambda i: (i, 0)),
            resident(w1f), resident(t1),
            resident(w2f), resident(t2),
            resident(w3f), resident(t3),
            resident(w4f), resident(b4f),
        ],
        out_specs=pl.BlockSpec((tm, out_dim), lambda i: (i, 0)),
        compiler_params=pltpu.CompilerParams(
            dimension_semantics=("parallel",)),
    )(x, w1f, t1, w2f, t2, w3f, t3, w4f, b4f)

    if b_pad != B:
        out = out[:B]
    return out


# ----------------------------------------------------------------------------
# Synthetic parameters + pure-JAX reference
# ----------------------------------------------------------------------------
def init_params(key, input_dim, output_dim, hidden_dim=(256, 128, 64)):
    """Deterministic synthetic parameters (shapes match MLPModel1.__init__)."""
    dims = [input_dim, hidden_dim[0], hidden_dim[1], hidden_dim[2], output_dim]
    keys = jax.random.split(key, 8)
    params = []
    k_idx = 0
    for li in range(3):  # linear1/2/3 + bn1/2/3
        din, dout = dims[li], dims[li + 1]
        w = jax.random.normal(keys[k_idx], (din, dout), jnp.float32) * 0.05
        b = jax.random.normal(keys[k_idx + 1], (dout,), jnp.float32) * 0.05
        k_idx += 2
        gamma = jnp.ones((dout,), jnp.float32)
        beta = jnp.zeros((dout,), jnp.float32)
        rmean = jnp.zeros((dout,), jnp.float32)
        rvar = jnp.ones((dout,), jnp.float32)
        params += [w, b, gamma, beta, rmean, rvar]
    din, dout = dims[3], dims[4]
    w4 = jax.random.normal(keys[k_idx], (din, dout), jnp.float32) * 0.05
    b4 = jax.random.normal(keys[k_idx + 1], (dout,), jnp.float32) * 0.05
    params += [w4, b4]
    return tuple(params)


def reference_forward(x, params):
    """Pure-JAX f32 reference (same eval-mode semantics; dropout = identity)."""
    (w1, b1, g1, be1, m1, v1,
     w2, b2, g2, be2, m2, v2,
     w3, b3, g3, be3, m3, v3,
     w4, b4) = params

    def block(h, w, b, g, be, m, v):
        z = h @ w + b
        z = g * (z - m) / jnp.sqrt(v + 1e-5) + be
        return jax.nn.sigmoid(z)

    h = block(x, w1, b1, g1, be1, m1, v1)
    h = block(h, w2, b2, g2, be2, m2, v2)
    h = block(h, w3, b3, g3, be3, m3, v3)
    return jnp.maximum(h @ w4 + b4, 0.0)


if __name__ == "__main__":
    key = jax.random.PRNGKey(0)
    k_x, k_p, k_x2 = jax.random.split(key, 3)

    batch, input_dim, output_dim = 16, 32, 8
    params = init_params(k_p, input_dim, output_dim)

    act_dtype = _select_act_dtype()           # bf16 on v6e/v7x, f32 on v5e
    folded = prepare_params(params, act_dtype)  # fold/cast ONCE, reuse per call

    # small single-tile case
    x = jax.random.normal(k_x, (batch, input_dim), jnp.float32)
    out = jax.block_until_ready(mlp_forward(x, folded, act_dtype=act_dtype))
    ref = reference_forward(x, params)
    assert out.shape == (batch, output_dim)
    assert jnp.allclose(out, ref, atol=2e-2, rtol=2e-2), "mismatch vs reference (small)"

    # multi-tile case: B=1200 -> tm=600, grid of 2 (zero pad rows, even v7x split)
    big_batch = 1200
    x2 = jax.random.normal(k_x2, (big_batch, input_dim), jnp.float32)
    out2 = jax.block_until_ready(mlp_forward(x2, folded, act_dtype=act_dtype))
    ref2 = reference_forward(x2, params)
    assert out2.shape == (big_batch, output_dim)
    assert jnp.allclose(out2, ref2, atol=2e-2, rtol=2e-2), "mismatch vs reference (tiled)"

    print("KERNEL_OK")
</pallas_src>

<mosaic_0001>
module attributes {stable_mosaic.version = 11 : i64} {
  func.func @_mlp_kernel(%arg0: i32, %arg1: memref<16x32xf32, #tpu.memory_space<vmem>>, %arg2: memref<32x256xbf16, #tpu.memory_space<vmem>>, %arg3: memref<1x256xf32, #tpu.memory_space<vmem>>, %arg4: memref<256x128xbf16, #tpu.memory_space<vmem>>, %arg5: memref<1x128xf32, #tpu.memory_space<vmem>>, %arg6: memref<128x64xbf16, #tpu.memory_space<vmem>>, %arg7: memref<1x64xf32, #tpu.memory_space<vmem>>, %arg8: memref<64x8xbf16, #tpu.memory_space<vmem>>, %arg9: memref<1x8xf32, #tpu.memory_space<vmem>>, %arg10: memref<16x8xf32, #tpu.memory_space<vmem>>) attributes {dimension_semantics = [#tpu.dimension_semantics<parallel>], iteration_bounds = array<i64: 1>, scalar_prefetch = 0 : i64, scratch_operands = 0 : i64, tpu.core_type = #tpu.core_type<tc>, window_params = [{transform_indices = @transform_0, window_bounds = array<i64: 16, 32>}, {pipeline_mode = #tpu.pipeline_mode<synchronous>, transform_indices = @transform_1, window_bounds = array<i64: 32, 256>}, {pipeline_mode = #tpu.pipeline_mode<synchronous>, transform_indices = @transform_2, window_bounds = array<i64: 1, 256>}, {pipeline_mode = #tpu.pipeline_mode<synchronous>, transform_indices = @transform_3, window_bounds = array<i64: 256, 128>}, {pipeline_mode = #tpu.pipeline_mode<synchronous>, transform_indices = @transform_4, window_bounds = array<i64: 1, 128>}, {pipeline_mode = #tpu.pipeline_mode<synchronous>, transform_indices = @transform_5, window_bounds = array<i64: 128, 64>}, {pipeline_mode = #tpu.pipeline_mode<synchronous>, transform_indices = @transform_6, window_bounds = array<i64: 1, 64>}, {pipeline_mode = #tpu.pipeline_mode<synchronous>, transform_indices = @transform_7, window_bounds = array<i64: 64, 8>}, {pipeline_mode = #tpu.pipeline_mode<synchronous>, transform_indices = @transform_8, window_bounds = array<i64: 1, 8>}, {transform_indices = @transform_9, window_bounds = array<i64: 16, 8>}]} {
    %c0 = arith.constant 0 : index
    %c0_0 = arith.constant 0 : index
    %0 = vector.load %arg1[%c0, %c0_0] : memref<16x32xf32, #tpu.memory_space<vmem>>, vector<16x32xf32>
    %1 = arith.truncf %0 : vector<16x32xf32> to vector<16x32xbf16>
    %c0_1 = arith.constant 0 : index
    %c0_2 = arith.constant 0 : index
    %2 = vector.load %arg2[%c0_1, %c0_2] : memref<32x256xbf16, #tpu.memory_space<vmem>>, vector<32x256xbf16>
    %cst = arith.constant dense<0.000000e+00> : vector<16x256xf32>
    %3 = tpu.matmul %1, %2, %cst {dimension_numbers = #tpu.dot_dimension_numbers<[1], [0], [0], [1], [0, 0, 1, 1], [], []>} : vector<16x32xbf16>, vector<32x256xbf16>, vector<16x256xf32> -> vector<16x256xf32>
    %c0_3 = arith.constant 0 : index
    %c0_4 = arith.constant 0 : index
    %4 = vector.load %arg3[%c0_3, %c0_4] : memref<1x256xf32, #tpu.memory_space<vmem>>, vector<1x256xf32>
    %5 = vector.broadcast %4 : vector<1x256xf32> to vector<16x256xf32>
    %6 = arith.addf %3, %5 : vector<16x256xf32>
    %cst_5 = arith.constant 0.000000e+00 : f32
    %7 = vector.broadcast %cst_5 : f32 to vector<16x256xf32>
    %8 = arith.subf %7, %6 : vector<16x256xf32>
    %9 = math.exp %8 : vector<16x256xf32>
    %cst_6 = arith.constant 1.000000e+00 : f32
    %10 = vector.broadcast %cst_6 : f32 to vector<16x256xf32>
    %11 = arith.addf %10, %9 : vector<16x256xf32>
    %12 = tpu.reciprocal %11 {approx = true} : vector<16x256xf32> -> vector<16x256xf32>
    %13 = arith.truncf %12 : vector<16x256xf32> to vector<16x256xbf16>
    %c0_7 = arith.constant 0 : index
    %c0_8 = arith.constant 0 : index
    %14 = vector.load %arg4[%c0_7, %c0_8] : memref<256x128xbf16, #tpu.memory_space<vmem>>, vector<256x128xbf16>
    %cst_9 = arith.constant dense<0.000000e+00> : vector<16x128xf32>
    %15 = tpu.matmul %13, %14, %cst_9 {dimension_numbers = #tpu.dot_dimension_numbers<[1], [0], [0], [1], [0, 0, 1, 1], [], []>} : vector<16x256xbf16>, vector<256x128xbf16>, vector<16x128xf32> -> vector<16x128xf32>
    %c0_10 = arith.constant 0 : index
    %c0_11 = arith.constant 0 : index
    %16 = vector.load %arg5[%c0_10, %c0_11] : memref<1x128xf32, #tpu.memory_space<vmem>>, vector<1x128xf32>
    %17 = vector.broadcast %16 : vector<1x128xf32> to vector<16x128xf32>
    %18 = arith.addf %15, %17 : vector<16x128xf32>
    %cst_12 = arith.constant 0.000000e+00 : f32
    %19 = vector.broadcast %cst_12 : f32 to vector<16x128xf32>
    %20 = arith.subf %19, %18 : vector<16x128xf32>
    %21 = math.exp %20 : vector<16x128xf32>
    %cst_13 = arith.constant 1.000000e+00 : f32
    %22 = vector.broadcast %cst_13 : f32 to vector<16x128xf32>
    %23 = arith.addf %22, %21 : vector<16x128xf32>
    %24 = tpu.reciprocal %23 {approx = true} : vector<16x128xf32> -> vector<16x128xf32>
    %25 = arith.truncf %24 : vector<16x128xf32> to vector<16x128xbf16>
    %c0_14 = arith.constant 0 : index
    %c0_15 = arith.constant 0 : index
    %26 = vector.load %arg6[%c0_14, %c0_15] : memref<128x64xbf16, #tpu.memory_space<vmem>>, vector<128x64xbf16>
    %cst_16 = arith.constant dense<0.000000e+00> : vector<16x64xf32>
    %27 = tpu.matmul %25, %26, %cst_16 {dimension_numbers = #tpu.dot_dimension_numbers<[1], [0], [0], [1], [0, 0, 1, 1], [], []>} : vector<16x128xbf16>, vector<128x64xbf16>, vector<16x64xf32> -> vector<16x64xf32>
    %c0_17 = arith.constant 0 : index
    %c0_18 = arith.constant 0 : index
    %28 = vector.load %arg7[%c0_17, %c0_18] : memref<1x64xf32, #tpu.memory_space<vmem>>, vector<1x64xf32>
    %29 = vector.broadcast %28 : vector<1x64xf32> to vector<16x64xf32>
    %30 = arith.addf %27, %29 : vector<16x64xf32>
    %cst_19 = arith.constant 0.000000e+00 : f32
    %31 = vector.broadcast %cst_19 : f32 to vector<16x64xf32>
    %32 = arith.subf %31, %30 : vector<16x64xf32>
    %33 = math.exp %32 : vector<16x64xf32>
    %cst_20 = arith.constant 1.000000e+00 : f32
    %34 = vector.broadcast %cst_20 : f32 to vector<16x64xf32>
    %35 = arith.addf %34, %33 : vector<16x64xf32>
    %36 = tpu.reciprocal %35 {approx = true} : vector<16x64xf32> -> vector<16x64xf32>
    %37 = arith.truncf %36 : vector<16x64xf32> to vector<16x64xbf16>
    %c0_21 = arith.constant 0 : index
    %c0_22 = arith.constant 0 : index
    %38 = vector.load %arg8[%c0_21, %c0_22] : memref<64x8xbf16, #tpu.memory_space<vmem>>, vector<64x8xbf16>
    %cst_23 = arith.constant dense<0.000000e+00> : vector<16x8xf32>
    %39 = tpu.matmul %37, %38, %cst_23 {dimension_numbers = #tpu.dot_dimension_numbers<[1], [0], [0], [1], [0, 0, 1, 1], [], []>} : vector<16x64xbf16>, vector<64x8xbf16>, vector<16x8xf32> -> vector<16x8xf32>
    %c0_24 = arith.constant 0 : index
    %c0_25 = arith.constant 0 : index
    %40 = vector.load %arg9[%c0_24, %c0_25] : memref<1x8xf32, #tpu.memory_space<vmem>>, vector<1x8xf32>
    %41 = vector.broadcast %40 : vector<1x8xf32> to vector<16x8xf32>
    %42 = arith.addf %39, %41 : vector<16x8xf32>
    %cst_26 = arith.constant 0.000000e+00 : f32
    %43 = vector.broadcast %cst_26 : f32 to vector<16x8xf32>
    %44 = arith.maximumf %42, %43 : vector<16x8xf32>
    %c0_27 = arith.constant 0 : index
    %c0_28 = arith.constant 0 : index
    %45 = vector.load %arg10[%c0_27, %c0_28] : memref<16x8xf32, #tpu.memory_space<vmem>>, vector<16x8xf32>
    tpu.vector_store %arg10[%c0_27, %c0_28], %44 {strides = array<i32>} : memref<16x8xf32, #tpu.memory_space<vmem>>, vector<16x8xf32>,
    return
  }
  func.func @transform_0(%arg0: i32) -> (i32, i32) {
    %c0_i32 = arith.constant 0 : i32
    %c0_i32_0 = arith.constant 0 : i32
    return %arg0, %c0_i32 : i32, i32
  }
  func.func @transform_1(%arg0: i32) -> (i32, i32) {
    %c0_i32 = arith.constant 0 : i32
    %c0_i32_0 = arith.constant 0 : i32
    %c0_i32_1 = arith.constant 0 : i32
    return %c0_i32, %c0_i32_0 : i32, i32
  }
  func.func @transform_2(%arg0: i32) -> (i32, i32) {
    %c0_i32 = arith.constant 0 : i32
    %c0_i32_0 = arith.constant 0 : i32
    %c0_i32_1 = arith.constant 0 : i32
    return %c0_i32, %c0_i32_0 : i32, i32
  }
  func.func @transform_3(%arg0: i32) -> (i32, i32) {
    %c0_i32 = arith.constant 0 : i32
    %c0_i32_0 = arith.constant 0 : i32
    %c0_i32_1 = arith.constant 0 : i32
    return %c0_i32, %c0_i32_0 : i32, i32
  }
  func.func @transform_4(%arg0: i32) -> (i32, i32) {
    %c0_i32 = arith.constant 0 : i32
    %c0_i32_0 = arith.constant 0 : i32
    %c0_i32_1 = arith.constant 0 : i32
    return %c0_i32, %c0_i32_0 : i32, i32
  }
  func.func @transform_5(%arg0: i32) -> (i32, i32) {
    %c0_i32 = arith.constant 0 : i32
    %c0_i32_0 = arith.constant 0 : i32
    %c0_i32_1 = arith.constant 0 : i32
    return %c0_i32, %c0_i32_0 : i32, i32
  }
  func.func @transform_6(%arg0: i32) -> (i32, i32) {
    %c0_i32 = arith.constant 0 : i32
    %c0_i32_0 = arith.constant 0 : i32
    %c0_i32_1 = arith.constant 0 : i32
    return %c0_i32, %c0_i32_0 : i32, i32
  }
  func.func @transform_7(%arg0: i32) -> (i32, i32) {
    %c0_i32 = arith.constant 0 : i32
    %c0_i32_0 = arith.constant 0 : i32
    %c0_i32_1 = arith.constant 0 : i32
    return %c0_i32, %c0_i32_0 : i32, i32
  }
  func.func @transform_8(%arg0: i32) -> (i32, i32) {
    %c0_i32 = arith.constant 0 : i32
    %c0_i32_0 = arith.constant 0 : i32
    %c0_i32_1 = arith.constant 0 : i32
    return %c0_i32, %c0_i32_0 : i32, i32
  }
  func.func @transform_9(%arg0: i32) -> (i32, i32) {
    %c0_i32 = arith.constant 0 : i32
    %c0_i32_0 = arith.constant 0 : i32
    return %arg0, %c0_i32 : i32, i32
  }
}

</mosaic_0001>

<bundles_post_ra>
// kernel: mlp_forward.1
= control target key start
LH: loop header
LB: loop body
LE: loop exit
PB: predicated region body
PF: predicated region fallthrough
CT: control target
= control target key end

     0   :  { %14 = vsyncpa [#allocation3], 0  ;;  %s983_s0 = inlined_call_operand.hbm [shape: f32[16,32], index: 0, kind: input, shape index: {}]   ;;  %s984_s1 = inlined_call_operand.hbm [shape: bf16[32,256], index: 1, kind: input, shape index: {}]   ;;  %s985_s2 = inlined_call_operand.vmem [shape: f32[1,256], index: 2, kind: input, shape index: {}]   ;;  %s986_s3 = inlined_call_operand.vmem [shape: bf16[256,128], index: 3, kind: input, shape index: {}]   ;;  %s987_s4 = inlined_call_operand.vmem [shape: f32[1,128], index: 4, kind: input, shape index: {}]   ;;  %s988_s5 = inlined_call_operand.vmem [shape: bf16[128,64], index: 5, kind: input, shape index: {}]   ;;  %s989_s6 = inlined_call_operand.vmem [shape: f32[1,64], index: 6, kind: input, shape index: {}]   ;;  %s990_s7 = inlined_call_operand.vmem [shape: bf16[64,8], index: 7, kind: input, shape index: {}]   ;;  %s991_s8 = inlined_call_operand.vmem [shape: f32[1,8], index: 8, kind: input, shape index: {}]   ;;  %s992_s9 = inlined_call_operand.vmem [shape: f32[16,8], index: 9, kind: output, shape index: {}]  }
   0x1   :  { %15 = vsyncpa [#allocation5], 0  ;;  %s800_s30 = smov [#allocation2]   ;;  %s752_s13 = scalar_lea.hbm %s983_s0, 256 }
   0x2   :  { %s21_s10 = sshll.u32 %s800_s30, 4  ;;  %p753_p0 = scmp.ne.s32.totalorder %s983_s0, %s752_s13  ;;  %s22_s10 = int_to_ptr.vmem [resolvable:$true] %s21_s10 }
   0x3   :  { %p756_p1 = scmp.lt.u32.totalorder %s752_s13, %s983_s0 }
   0x5   :  { %p758_p2 = pnand %p756_p1, %p753_p0 }
   0x7   :  { %761 = shalt.err (!%p758_p2)
}
   0x8   :  { %s762_s18 = scalar_lea.vmem %s22_s10, 256  ;;  %p767_p4 = scmp.lt.s32.totalorder %s22_s10, %s22_s10 }
   0x9   :  { %p763_p3 = scmp.ne.s32.totalorder %s22_s10, %s762_s18  ;;  %p768_p5 = scmp.lt.s32.totalorder %s762_s18, %s762_s18 }
   0xb   :  { %p769_p6 = por %p768_p5, %p767_p4 }
   0xd   :  { %p770_p7 = pnand %p769_p6, %p763_p3 }
   0xf   :  { %773 = shalt.err (!%p770_p7)
}
  0x10   :  { %s801_s19 = smov 128   ;;  %s802_s20 = smov 8  }
  0x11   :  { %27 = dma.hbm_to_vmem [thread:$0]  %s983_s0, 256, %s22_s10, [#allocation3], %s801_s19, %s801_s19, %s802_s20  }
  0x12   :  { %s803_s23 = smov [#allocation4]   ;;  %s774_s27 = scalar_lea.hbm %s984_s1, 512 }
  0x13   :  { %s33_s24 = sshll.u32 %s803_s23, 4  ;;  %p775_p8 = scmp.ne.s32.totalorder %s984_s1, %s774_s27  ;;  %s34_s24 = int_to_ptr.vmem [resolvable:$true] %s33_s24 }
  0x14   :  { %p778_p9 = scmp.lt.u32.totalorder %s774_s27, %s984_s1 }
  0x16   :  { %p780_p10 = pnand %p778_p9, %p775_p8 }
  0x18   :  { %783 = shalt.err (!%p780_p10)
}
  0x19   :  { %s784_s12 = scalar_lea.vmem %s34_s24, 512  ;;  %p789_p12 = scmp.lt.s32.totalorder %s34_s24, %s34_s24 }
  0x1a   :  { %p785_p11 = scmp.ne.s32.totalorder %s34_s24, %s784_s12  ;;  %p790_p13 = scmp.lt.s32.totalorder %s784_s12, %s784_s12 }
  0x1c   :  { %p791_p0 = por %p790_p13, %p789_p12 }
  0x1e   :  { %p792_p1 = pnand %p791_p0, %p785_p11 }
  0x20   :  { %795 = shalt.err (!%p792_p1)
}
  0x21   :  { %39 = dma.hbm_to_vmem [thread:$0]  %s984_s1, 512, %s34_s24, [#allocation5], %s801_s19, %s801_s19, %s802_s20  }
  0x22   :  { %796 = dma.done.wait [#allocation3], 256  }
  0x23   :  { %797 = vsyncadd [#allocation3], 4294967040 }
  0x24   :  { %798 = dma.done.wait [#allocation5], 512  }
  0x25   :  { %799 = vsyncadd [#allocation5], 4294966784  ;;  %v804_v0 = vmov 0   ;;  %v686_v1 = vld [vmem:[#allocation4 + $0x4] ss:$8 sps:$4 sm:$0xff]   ;;  %v61_v5 = vld [vmem:[#allocation2] sm:$0xff]  ;;  %v70_v24 = vlaneseq }
  0x26   :  { %136 = vmatprep.mubr.bf16.mxu0 %v804_v0  ;;  %v688_v2 = vld [vmem:[#allocation4] ss:$8 sps:$4 sm:$0xff]   ;;  %104 = vmatprep.subr.bf16.mxu0 %v686_v1  ;;  %v689_v3 = vld [vmem:[#allocation4 + $0x14] ss:$8 sps:$4 sm:$0xff]   ;;  %v691_v4 = vld [vmem:[#allocation4 + $0x10] ss:$8 sps:$4 sm:$0xff]  }
  0x27   :  { %105 = vmatpush1.bf16.msra.mxu0 %v688_v2  ;;  %v62_v6 = vld [vmem:[#allocation2 + $0x8] sm:$0xff]  ;;  %vm100_vm0 = vcmask 261120   ;;  %v692_v8 = vld [vmem:[%s986_s3 + $0x40] sm:$0xff]   ;;  %v696_v12 = vld [vmem:[%s986_s3 + $0x50] sm:$0xff]   ;;  %v71_v25 = vshrl.u32 %v70_v24, 7  ;;  %v805_v62 = vmov 0.0  }
  0x28   :  { %106 = vmatprep.subr.bf16.mxu0 %v689_v3  ;;  %v63_v7 = vpack.c.bf16 %v62_v6, %v61_v5  ;;  %v693_v9 = vld [vmem:[%s986_s3] sm:$0xff]   ;;  %611 = vmatprep.subr.bf16.mxu1 %v692_v8  ;;  %v694_v10 = vld [vmem:[%s986_s3 + $0x48] sm:$0xff]   ;;  %v697_v13 = vld [vmem:[%s986_s3 + $0x10] sm:$0xff]   ;;  %vm806_vm1 = vmmov 0   ;;  %vm518_vm2 = vcmask 523264   ;;  %vm565_vm3 = vcmask 64512  }
  0x29   :  { %612 = vmatpush3.bf16.msra.mxu1 %v693_v9  ;;  %v695_v11 = vld [vmem:[%s986_s3 + $0x8] sm:$0xff]   ;;  %v698_v14 = vld [vmem:[%s986_s3 + $0x58] sm:$0xff]   ;;  %v700_v16 = vld [vmem:[%s986_s3 + $0x60] sm:$0xff]   ;;  %v72_v26 = vsub.s32 0, %v71_v25  ;;  %v76_v28 = vsub.s32 1, %v71_v25 }
  0x2a   :  { %613 = vmatprep.subr.bf16.mxu1 %v694_v10  ;;  %v699_v15 = vld [vmem:[%s986_s3 + $0x18] sm:$0xff]   ;;  %v701_v17 = vld [vmem:[%s986_s3 + $0x20] sm:$0xff]   ;;  %v702_v18 = vld [vmem:[%s986_s3 + $0x68] sm:$0xff]  }
  0x2b   :  { %107 = vmatpush1.bf16.msra.mxu0 %v691_v4  ;;  %v703_v19 = vld [vmem:[%s986_s3 + $0x28] sm:$0xff]   ;;  %v704_v20 = vld [vmem:[%s986_s3 + $0x70] sm:$0xff]   ;;  %v706_v22 = vld [vmem:[%s986_s3 + $0x78] sm:$0xff]  }
  0x2c   :  { %v705_v21 = vld [vmem:[%s986_s3 + $0x30] sm:$0xff]   ;;  %v707_v23 = vld [vmem:[%s986_s3 + $0x38] sm:$0xff]   ;;  %v68_v27 = vld [vmem:[%s985_s2] sm:$0x3]  ;;  %647 = vmatprep.subr.bf16.mxu0 %v805_v62 }
  0x2d   :  { %614 = vmatpush3.bf16.msra.mxu1 %v695_v11  ;;  %v73_v29 = vrot.slane %v68_v27, %v72_v26  ;;  %v77_v30 = vrot.slane %v68_v27, %v76_v28  ;;  %v708_v61 = vld [vmem:[%s988_s5] sm:$0xff]   ;;  %v709_v63 = vld [vmem:[%s988_s5 + $0x8] sm:$0xff]   ;;  %v710_v0 = vld [vmem:[%s988_s5 + $0x10] sm:$0xff]  }
  0x2e   :  { %578 = vmatmul.mubr.msk.bf16.vlgmr.msra.gmra.mrb[0].mxu0 %vm100_vm0, %v63_v7  ;;  %615 = vmatprep.subr.bf16.mxu1 %v696_v12  ;;  %v711_v1 = vld [vmem:[%s988_s5 + $0x18] sm:$0xff]   ;;  %v712_v2 = vld [vmem:[%s988_s5 + $0x20] sm:$0xff]   ;;  %v713_v3 = vld [vmem:[%s988_s5 + $0x28] sm:$0xff]  }
  0x2f   :  { %648 = vmatpush3.bf16.msra.mxu0 %v708_v61  ;;  %663 = vmatprep.mubr.msk.bf16.mxu0 %vm806_vm1, %v805_v62  ;;  %v714_v4 = vld [vmem:[%s988_s5 + $0x30] sm:$0xff]   ;;  %v715_v5 = vld [vmem:[%s988_s5 + $0x38] sm:$0xff]   ;;  %v579_v7 = vld [vmem:[%s987_s4] ss:$0 sm:$0xff] }
  0x30   :  { %649 = vmatprep.subr.bf16.mxu0 %v805_v62  ;;  %v716_v26 = vld [vmem:[%s990_s7] sm:$0xff]   ;;  %v717_v27 = vld [vmem:[%s990_s7 + $0x8] sm:$0xff]   ;;  %v718_v28 = vld [vmem:[%s990_s7 + $0x10] sm:$0xff]  }
  0x31   :  { %616 = vmatpush3.bf16.msra.mxu1 %v697_v13 }
  0x32   :  { %617 = vmatprep.subr.bf16.mxu1 %v698_v14 }
  0x33   :  { %650 = vmatpush3.bf16.msra.mxu0 %v709_v63 }
  0x34   :  { %651 = vmatprep.subr.bf16.mxu0 %v805_v62 }
  0x35   :  { %618 = vmatpush3.bf16.msra.mxu1 %v699_v15 }
  0x36   :  { %619 = vmatprep.subr.bf16.mxu1 %v700_v16 }
  0x37   :  { %652 = vmatpush3.bf16.msra.mxu0 %v710_v0 }
  0x38   :  { %653 = vmatprep.subr.bf16.mxu0 %v805_v62 }
  0x39   :  { %620 = vmatpush3.bf16.msra.mxu1 %v701_v17 }
  0x3a   :  { %621 = vmatprep.subr.bf16.mxu1 %v702_v18 }
  0x3b   :  { %654 = vmatpush3.bf16.msra.mxu0 %v711_v1 }
  0x3c   :  { %655 = vmatprep.subr.bf16.mxu0 %v805_v62 }
  0x3d   :  { %622 = vmatpush3.bf16.msra.mxu1 %v703_v19 }
  0x3e   :  { %623 = vmatprep.subr.bf16.mxu1 %v704_v20 }
  0x3f   :  { %656 = vmatpush3.bf16.msra.mxu0 %v712_v2 }
  0x40   :  { %657 = vmatprep.subr.bf16.mxu0 %v805_v62 }
  0x41   :  { %624 = vmatpush3.bf16.msra.mxu1 %v705_v21 }
  0x42   :  { %625 = vmatprep.subr.bf16.mxu1 %v706_v22 }
  0x43   :  { %658 = vmatpush3.bf16.msra.mxu0 %v713_v3 }
  0x44   :  { %659 = vmatprep.subr.bf16.mxu0 %v805_v62 }
  0x45   :  { %626 = vmatpush3.bf16.msra.mxu1 %v707_v23 }
  0x46   :  { %667 = vmatprep.subr.bf16.mxu1 %v805_v62 }
  0x47   :  { %660 = vmatpush3.bf16.msra.mxu0 %v714_v4 }
  0x48   :  { %661 = vmatprep.subr.bf16.mxu0 %v805_v62 }
  0x4b   :  { %662 = vmatpush3.bf16.msra.mxu0 %v715_v5 }
 0x101   :  { %v138_v31 = vpop.f32.mrb[0].mxu0 }
 0x102   :  { %v139_v32 = vadd.f32 %v138_v31, %v73_v29  ;;  %v140_v33 = vpop.f32.mrb[1].mxu0 }
 0x103   :  { %v141_v34 = vadd.f32 %v140_v33, %v77_v30  ;;  %v142_v35 = vpop.f32.mrb[2].mxu0 }
 0x104   :  { %v147_v36 = vsub.f32 0.0, %v139_v32  ;;  %v143_v37 = vadd.f32 %v142_v35, %v73_v29  ;;  %v144_v38 = vpop.f32.mrb[3].mxu0  ;;  %v719_v29 = vld [vmem:[%s990_s7 + $0x18] sm:$0xff]  }
 0x105   :  { %v148_v39 = vsub.f32 0.0, %v141_v34  ;;  %v145_v40 = vadd.f32 %v144_v38, %v77_v30  ;;  %v596_v30 = vld [vmem:[%s989_s6] ss:$0 sm:$0xff] }
 0x106   :  { %v151_v41 = vmul.f32 1.442695, %v147_v36  ;;  %v149_v42 = vsub.f32 0.0, %v143_v37 }
 0x107   :  { %v153_v43 = vmul.f32 1.442695, %v148_v39  ;;  %v150_v44 = vsub.f32 0.0, %v145_v40 }
 0x108   :  { %720 = vpow2.f32 %v151_v41  ;;  %v155_v45 = vmul.f32 1.442695, %v149_v42 }
 0x109   :  { %722 = vpow2.f32 %v153_v43  ;;  %v157_v46 = vmul.f32 1.442695, %v150_v44 }
 0x10a   :  { %724 = vpow2.f32 %v155_v45 }
 0x10b   :  { %726 = vpow2.f32 %v157_v46 }
 0x112   :  { %v721_v47 = vpop.eup %720 }
 0x113   :  { %v723_v48 = vpop.eup %722  ;;  %v159_v49 = vadd.f32 1.0, %v721_v47 }
 0x114   :  { %v725_v50 = vpop.eup %724  ;;  %v160_v51 = vadd.f32 1.0, %v723_v48  ;;  %v605_v48 = vld [vmem:[%s991_s8] ss:$0 sm:$0xff] }
 0x115   :  { %v727_v52 = vpop.eup %726  ;;  %728 = vrcp.f32 %v159_v49  ;;  %v161_v53 = vadd.f32 1.0, %v725_v50 }
 0x116   :  { %730 = vrcp.f32 %v160_v51  ;;  %v162_v54 = vadd.f32 1.0, %v727_v52 }
 0x117   :  { %732 = vrcp.f32 %v161_v53 }
 0x118   :  { %734 = vrcp.f32 %v162_v54 }
 0x11f   :  { %v729_v55 = vpop.eup %728 }
 0x120   :  { %v731_v56 = vpop.eup %730 }
 0x121   :  { %v733_v57 = vpop.eup %732 }
 0x122   :  { %v735_v58 = vpop.eup %734  ;;  %v167_v59 = vpack.c.bf16 %v733_v57, %v729_v55 }
 0x123   :  { %v168_v60 = vpack.c.bf16 %v735_v58, %v731_v56 }
 0x125   :  { %336 = vmatprep.mubr.bf16.mxu1 %v168_v60 }
 0x126   :  { %337 = vmatmul.mubr.bf16.vlgmr.msra.gmra.mrb[0].mxu1 %v167_v59 }
 0x127   :  { %675 = vmatprep.mubr.msk.bf16.mxu1 %vm806_vm1, %v805_v62  ;;  %668 = vmatpush3.bf16.msra.mxu1 %v716_v26 }
 0x128   :  { %669 = vmatprep.subr.bf16.mxu1 %v805_v62 }
 0x12b   :  { %670 = vmatpush3.bf16.msra.mxu1 %v717_v27 }
 0x12c   :  { %671 = vmatprep.subr.bf16.mxu1 %v805_v62 }
 0x12f   :  { %672 = vmatpush3.bf16.msra.mxu1 %v718_v28 }
 0x130   :  { %673 = vmatprep.subr.bf16.mxu1 %v805_v62 }
 0x133   :  { %674 = vmatpush3.bf16.msra.mxu1 %v719_v29 }
 0x1f9   :  { %v627_v6 = vpop.f32.mrb[0].mxu1 }
 0x1fa   :  { %v628_v8 = vpop.f32.mrb[1].mxu1 }
 0x1fb   :  { %v629_v9 = vadd.f32 %v628_v8, %v627_v6  ;;  %v630_v10 = vpop.f32.mrb[2].mxu1 }
 0x1fc   :  { %v631_v11 = vpop.f32.mrb[3].mxu1 }
 0x1fd   :  { %v339_v12 = vadd.f32 %v629_v9, %v579_v7  ;;  %v632_v13 = vadd.f32 %v631_v11, %v630_v10 }
 0x1ff   :  { %v345_v14 = vsub.f32 0.0, %v339_v12  ;;  %v342_v15 = vadd.f32 %v632_v13, %v579_v7 }
 0x201   :  { %v347_v16 = vmul.f32 1.442695, %v345_v14  ;;  %v346_v17 = vsub.f32 0.0, %v342_v15 }
 0x203   :  { %736 = vpow2.f32 %v347_v16  ;;  %v349_v18 = vmul.f32 1.442695, %v346_v17 }
 0x205   :  { %738 = vpow2.f32 %v349_v18 }
 0x20d   :  { %v737_v19 = vpop.eup %736 }
 0x20e   :  { %v351_v20 = vadd.f32 1.0, %v737_v19 }
 0x20f   :  { %v739_v21 = vpop.eup %738 }
 0x210   :  { %v352_v22 = vadd.f32 1.0, %v739_v21  ;;  %740 = vrcp.f32 %v351_v20 }
 0x212   :  { %742 = vrcp.f32 %v352_v22 }
 0x21a   :  { %v741_v23 = vpop.eup %740 }
 0x21c   :  { %v743_v24 = vpop.eup %742 }
 0x21d   :  { %v355_v25 = vpack.c.bf16 %v743_v24, %v741_v23 }
 0x21f   :  { %664 = vmatmul.mubr.bf16.vlgmr.msra.gmra.mrb[4].mxu0 %v355_v25 }
 0x2f2   :  { %v461_v31 = vpop.f32.mrb[4].mxu0 }
 0x2f3   :  { %v462_v32 = vadd.f32 %v596_v30, %v461_v31  ;;  %v665_v33 = vpop.f32.mrb[5].mxu0 }
 0x2f4   :  { %v464_v34 = vpop.f32.mrb[6].mxu0 }
 0x2f5   :  { %v468_v35 = vsub.f32 0.0, %v462_v32  ;;  %v465_v36 = vadd.f32 %v596_v30, %v464_v34  ;;  %v666_v37 = vpop.f32.mrb[7].mxu0 }
 0x2f7   :  { %v470_v38 = vmul.f32 1.442695, %v468_v35  ;;  %v469_v39 = vsub.f32 0.0, %v465_v36 }
 0x2f9   :  { %744 = vpow2.f32 %v470_v38  ;;  %v472_v40 = vmul.f32 1.442695, %v469_v39 }
 0x2fb   :  { %746 = vpow2.f32 %v472_v40 }
 0x303   :  { %v745_v41 = vpop.eup %744 }
 0x304   :  { %v474_v42 = vadd.f32 1.0, %v745_v41 }
 0x305   :  { %v747_v43 = vpop.eup %746 }
 0x306   :  { %v475_v44 = vadd.f32 1.0, %v747_v43  ;;  %748 = vrcp.f32 %v474_v42 }
 0x308   :  { %750 = vrcp.f32 %v475_v44 }
 0x310   :  { %v749_v45 = vpop.eup %748 }
 0x312   :  { %v751_v46 = vpop.eup %750 }
 0x313   :  { %v478_v47 = vpack.c.bf16 %v751_v46, %v749_v45 }
 0x315   :  { %676 = vmatmul.mubr.msk.bf16.vlgmr.msra.gmra.mrb[4].mxu1 %vm518_vm2, %v478_v47 }
 0x3e8   :  { %v556_v49 = vpop.f32.mrb[4].mxu1 }
 0x3e9   :  { %v557_v50 = vadd.f32 %v605_v48, %v556_v49  ;;  %v677_v51 = vpop.f32.mrb[5].mxu1 }
 0x3ea   :  { %v559_v52 = vpop.f32.mrb[6].mxu1 }
 0x3eb   :  { %v563_v53 = vmax.f32 %v557_v50, 0.0  ;;  %v560_v54 = vadd.f32 %v605_v48, %v559_v52  ;;  %v678_v55 = vpop.f32.mrb[7].mxu1 }
 0x3ed   :  { %566 = vst.msk [vmem:[%s992_s9] sm:$0xff] %vm565_vm3, %v563_v53  ;;  %v564_v56 = vmax.f32 %v560_v54, 0.0 }
 0x3ef   :  { %567 = vst.msk [vmem:[%s992_s9 + $0x8] sm:$0xff] %vm565_vm3, %v564_v56 }
 0x3f0   :  { %572 = vsyncpa [#allocation3], 1 }
 0x3f1   :  { %573 = vsyncpa [#allocation5], 1 }

</bundles_post_ra>
